<compile_context>
chip_gen: v5e
topology: v5e:2x2
jax: 0.10.0
libtpu: 0.0.40
codegen_flags: <defaults>
</compile_context>

<pallas_src>
import functools

import jax
import jax.numpy as jnp
from jax.experimental import pallas as pl
from jax.experimental.pallas import tpu as pltpu

HIDDEN = 32      # hidden_size
MID = 50         # out_features of first Linear
OUT = 12         # out_features of second Linear
LANE = 128       # TPU lane width


def _round_up(n, m):
    return ((n + m - 1) // m) * m


def _fused_kernel(x_ref, w_ref, b_ref, o_ref):
    # (blk, H) @ (H, OUT) on the MXU, f32 accumulate, bias add on the VPU.
    acc = jnp.dot(x_ref[...], w_ref[...], preferred_element_type=jnp.float32)
    o_ref[...] = (acc + b_ref[...]).astype(o_ref.dtype)


@functools.partial(jax.jit, static_argnames=("block_b",))
def aspect_detector(x, w1, b1, w2, b2, *, block_b=8192):
    """x: (B, H) f32. w1:(H,50) b1:(1,50) w2:(50,12) b2:(1,12) (stored (in,out),
    i.e. pre-transposed vs PyTorch's (out,in)).  Returns (B,12) = (x@w1+b1)@w2+b2.
    Note: the two Linears are fused algebraically (W = w1@w2), which changes fp
    rounding slightly vs the two-step reference."""
    B, H = x.shape
    assert H == w1.shape[0]

    # --- Algebraic fusion of the two Linear layers (tiny; fused by XLA) -------
    w_fused = (w1 @ w2).astype(x.dtype)            # (H, OUT), held resident
    b_fused = (b1 @ w2 + b2).astype(jnp.float32)   # (1, OUT)

    # --- Batch tile: 128-aligned, capped by block_b, >=2 grid steps if B>128 --
    blk = max(LANE, (min(block_b, _round_up(B, LANE)) // LANE) * LANE)
    if B > LANE:
        blk = min(blk, max(LANE, _round_up(-(-B // 2), LANE)))
    grid = (pl.cdiv(B, blk),)          # partial last block handled by Pallas

    cost = pl.CostEstimate(
        flops=2 * B * H * OUT,
        transcendentals=0,
        bytes_accessed=(B * H + B * OUT + OUT * (H + 1)) * 4,
    )

    return pl.pallas_call(
        _fused_kernel,
        out_shape=jax.ShapeDtypeStruct((B, OUT), x.dtype),
        grid_spec=pl.GridSpec(
            grid=grid,
            in_specs=[
                pl.BlockSpec((blk, H), lambda i: (i, 0)),    # x, native layout
                pl.BlockSpec((H, OUT), lambda i: (0, 0)),    # fused W (full)
                pl.BlockSpec((1, OUT), lambda i: (0, 0)),    # fused bias (full)
            ],
            out_specs=pl.BlockSpec((blk, OUT), lambda i: (i, 0)),
        ),
        compiler_params=pltpu.CompilerParams(
            dimension_semantics=("parallel",),
            vmem_limit_bytes=40 << 20,
        ),
        cost_estimate=cost,
    )(x, w_fused, b_fused)


def init_params(key, hidden_size=HIDDEN):
    """Deterministic synthetic params matching the nn.Linear layers (stored
    already transposed to (in, out))."""
    k1, k2, k3, k4 = jax.random.split(key, 4)
    w1 = jax.random.normal(k1, (hidden_size, MID), jnp.float32) * 0.05
    b1 = jax.random.normal(k2, (1, MID), jnp.float32) * 0.05
    w2 = jax.random.normal(k3, (MID, OUT), jnp.float32) * 0.05
    b2 = jax.random.normal(k4, (1, OUT), jnp.float32) * 0.05
    return w1, b1, w2, b2


if __name__ == "__main__":
    key = jax.random.PRNGKey(0)
    kx, kp = jax.random.split(key)
    B = 2
    x = jax.random.normal(kx, (B, HIDDEN), jnp.float32)
    w1, b1, w2, b2 = init_params(kp)

    out = aspect_detector(x, w1, b1, w2, b2)
    out = jax.block_until_ready(out)

    # Reference: same math as the PyTorch module (algebraic fusion differs only
    # by fp rounding -> slightly looser tolerance).
    ref = (x @ w1 + b1) @ w2 + b2
    assert out.shape == (B, OUT)
    assert jnp.allclose(out, ref, atol=1e-4, rtol=1e-4)
    print("KERNEL_OK")
</pallas_src>

<mosaic_0001>
module attributes {stable_mosaic.version = 11 : i64} {
  func.func @_fused_kernel(%arg0: i32, %arg1: memref<128x32xf32, #tpu.memory_space<vmem>>, %arg2: memref<32x12xf32, #tpu.memory_space<vmem>>, %arg3: memref<1x12xf32, #tpu.memory_space<vmem>>, %arg4: memref<128x12xf32, #tpu.memory_space<vmem>>) attributes {dimension_semantics = [#tpu.dimension_semantics<parallel>], iteration_bounds = array<i64: 1>, scalar_prefetch = 0 : i64, scratch_operands = 0 : i64, tpu.core_type = #tpu.core_type<tc>, window_params = [{transform_indices = @transform_0, window_bounds = array<i64: 128, 32>}, {pipeline_mode = #tpu.pipeline_mode<synchronous>, transform_indices = @transform_1, window_bounds = array<i64: 32, 12>}, {pipeline_mode = #tpu.pipeline_mode<synchronous>, transform_indices = @transform_2, window_bounds = array<i64: 1, 12>}, {transform_indices = @transform_3, window_bounds = array<i64: 128, 12>}]} {
    %c0 = arith.constant 0 : index
    %c0_0 = arith.constant 0 : index
    %0 = vector.load %arg1[%c0, %c0_0] : memref<128x32xf32, #tpu.memory_space<vmem>>, vector<128x32xf32>
    %c0_1 = arith.constant 0 : index
    %c0_2 = arith.constant 0 : index
    %1 = vector.load %arg2[%c0_1, %c0_2] : memref<32x12xf32, #tpu.memory_space<vmem>>, vector<32x12xf32>
    %cst = arith.constant dense<0.000000e+00> : vector<128x12xf32>
    %2 = tpu.matmul %0, %1, %cst {dimension_numbers = #tpu.dot_dimension_numbers<[1], [0], [0], [1], [0, 0, 1, 1], [], []>} : vector<128x32xf32>, vector<32x12xf32>, vector<128x12xf32> -> vector<128x12xf32>
    %c0_3 = arith.constant 0 : index
    %c0_4 = arith.constant 0 : index
    %3 = vector.load %arg3[%c0_3, %c0_4] : memref<1x12xf32, #tpu.memory_space<vmem>>, vector<1x12xf32>
    %4 = vector.broadcast %3 : vector<1x12xf32> to vector<128x12xf32>
    %5 = arith.addf %2, %4 : vector<128x12xf32>
    %c0_5 = arith.constant 0 : index
    %c0_6 = arith.constant 0 : index
    %6 = vector.load %arg4[%c0_5, %c0_6] : memref<128x12xf32, #tpu.memory_space<vmem>>, vector<128x12xf32>
    tpu.vector_store %arg4[%c0_5, %c0_6], %5 {strides = array<i32>} : memref<128x12xf32, #tpu.memory_space<vmem>>, vector<128x12xf32>,
    return
  }
  func.func @transform_0(%arg0: i32) -> (i32, i32) {
    %c0_i32 = arith.constant 0 : i32
    %c0_i32_0 = arith.constant 0 : i32
    return %arg0, %c0_i32 : i32, i32
  }
  func.func @transform_1(%arg0: i32) -> (i32, i32) {
    %c0_i32 = arith.constant 0 : i32
    %c0_i32_0 = arith.constant 0 : i32
    %c0_i32_1 = arith.constant 0 : i32
    return %c0_i32, %c0_i32_0 : i32, i32
  }
  func.func @transform_2(%arg0: i32) -> (i32, i32) {
    %c0_i32 = arith.constant 0 : i32
    %c0_i32_0 = arith.constant 0 : i32
    %c0_i32_1 = arith.constant 0 : i32
    return %c0_i32, %c0_i32_0 : i32, i32
  }
  func.func @transform_3(%arg0: i32) -> (i32, i32) {
    %c0_i32 = arith.constant 0 : i32
    %c0_i32_0 = arith.constant 0 : i32
    return %arg0, %c0_i32 : i32, i32
  }
}

</mosaic_0001>

<bundles_post_ra>
// kernel: aspect_detector.1
= control target key start
LH: loop header
LB: loop body
LE: loop exit
PB: predicated region body
PF: predicated region fallthrough
CT: control target
= control target key end

     0   :  { %s367_s0 = inlined_call_operand.vmem [shape: f32[2,32], index: 0, kind: input, shape index: {}]   ;;  %s368_s1 = inlined_call_operand.vmem [shape: f32[32,12], index: 1, kind: input, shape index: {}]   ;;  %s369_s2 = inlined_call_operand.vmem [shape: f32[1,12], index: 2, kind: input, shape index: {}]   ;;  %s370_s3 = inlined_call_operand.hbm [shape: f32[2,12], index: 3, kind: output, shape index: {}]  }
   0x1   :  { %v34_v0 = vld [vmem:[%s368_s1 + $0x18] sm:$0xff]  ;;  %v33_v1 = vld [vmem:[%s368_s1 + $0x10] sm:$0xff] }
   0x2   :  { %205 = vmatpush.msra.mxu2 %v34_v0  ;;  %206 = vmatpush.msra.mxu3 %v34_v0 }
   0x3   :  { %8 = vsyncpa [#allocation3], 0  ;;  %v32_v2 = vld [vmem:[%s368_s1 + $0x8] sm:$0xff]  ;;  %100 = vmatpush.msra.mxu0 %v34_v0  ;;  %204 = vmatpush.msra.mxu1 %v34_v0  ;;  %v31_v3 = vld [vmem:[%s368_s1] sm:$0xff]  ;;  %vm39_vm0 = vcmask 261120   ;;  %vm153_vm1 = vcmask 97280  }
   0x4   :  { %208 = vmatpush.msra.mxu2 %v33_v1  ;;  %209 = vmatpush.msra.mxu3 %v33_v1  ;;  %v23_v4 = vld [vmem:[%s367_s0 + $0x40] sm:$0xff]  ;;  %v24_v8 = vld [vmem:[%s367_s0 + $0x48] sm:$0xff]  ;;  %v25_v12 = vld [vmem:[%s367_s0 + $0x50] sm:$0xff] }
   0x5   :  { %101 = vmatpush.msra.mxu0 %v33_v1  ;;  %207 = vmatpush.msra.mxu1 %v33_v1  ;;  %v27_v5 = vld [vmem:[%s367_s0 + $0x60] sm:$0xff]  ;;  %v28_v9 = vld [vmem:[%s367_s0 + $0x68] sm:$0xff]  ;;  %v29_v13 = vld [vmem:[%s367_s0 + $0x70] sm:$0xff] }
   0x6   :  { %211 = vmatpush.msra.mxu2 %v32_v2  ;;  %212 = vmatpush.msra.mxu3 %v32_v2  ;;  %v15_v6 = vld [vmem:[%s367_s0] sm:$0xff]  ;;  %v16_v10 = vld [vmem:[%s367_s0 + $0x8] sm:$0xff]  ;;  %v17_v14 = vld [vmem:[%s367_s0 + $0x10] sm:$0xff] }
   0x7   :  { %102 = vmatpush.msra.mxu0 %v32_v2  ;;  %210 = vmatpush.msra.mxu1 %v32_v2  ;;  %v19_v7 = vld [vmem:[%s367_s0 + $0x20] sm:$0xff]  ;;  %v20_v11 = vld [vmem:[%s367_s0 + $0x28] sm:$0xff]  ;;  %v21_v15 = vld [vmem:[%s367_s0 + $0x30] sm:$0xff] }
   0x8   :  { %214 = vmatpush.msra.mxu2 %v31_v3  ;;  %215 = vmatpush.msra.mxu3 %v31_v3  ;;  %v26_v16 = vld [vmem:[%s367_s0 + $0x58] sm:$0xff]  ;;  %v219_v20 = vld [vmem:[%s369_s2] ss:$0 sm:$0xff] }
   0x9   :  { %196 = vmatmul.msk.f32.vlgmr.msra.gmra.mxu2 %vm39_vm0, %v23_v4  ;;  %200 = vmatmul.msk.f32.vlgmr.msra.gmra.mxu3 %vm39_vm0, %v27_v5  ;;  %v30_v17 = vld [vmem:[%s367_s0 + $0x78] sm:$0xff] }
   0xa   :  { %103 = vmatpush.msra.mxu0 %v31_v3  ;;  %213 = vmatpush.msra.mxu1 %v31_v3  ;;  %v18_v18 = vld [vmem:[%s367_s0 + $0x18] sm:$0xff] }
   0xb   :  { %188 = vmatmul.msk.f32.vlgmr.msra.gmra.mxu0 %vm39_vm0, %v15_v6  ;;  %192 = vmatmul.msk.f32.vlgmr.msra.gmra.mxu1 %vm39_vm0, %v19_v7  ;;  %v22_v19 = vld [vmem:[%s367_s0 + $0x38] sm:$0xff] }
  0x11   :  { %197 = vmatmul.msk.f32.gmra.mxu2 %vm39_vm0, %v24_v8  ;;  %201 = vmatmul.msk.f32.gmra.mxu3 %vm39_vm0, %v28_v9 }
  0x13   :  { %189 = vmatmul.msk.f32.gmra.mxu0 %vm39_vm0, %v16_v10  ;;  %193 = vmatmul.msk.f32.gmra.mxu1 %vm39_vm0, %v20_v11 }
  0x19   :  { %198 = vmatmul.msk.f32.gmra.mxu2 %vm39_vm0, %v25_v12  ;;  %202 = vmatmul.msk.f32.gmra.mxu3 %vm39_vm0, %v29_v13 }
  0x1b   :  { %190 = vmatmul.msk.f32.gmra.mxu0 %vm39_vm0, %v17_v14  ;;  %194 = vmatmul.msk.f32.gmra.mxu1 %vm39_vm0, %v21_v15 }
  0x21   :  { %199 = vmatmul.msk.f32.gmra.mxu2 %vm39_vm0, %v26_v16  ;;  %203 = vmatmul.msk.f32.gmra.mxu3 %vm39_vm0, %v30_v17 }
  0x23   :  { %191 = vmatmul.msk.f32.gmra.mxu0 %vm39_vm0, %v18_v18  ;;  %195 = vmatmul.msk.f32.gmra.mxu1 %vm39_vm0, %v22_v19 }
  0x88   :  { %v105_v21 = vpop.f32.mrf.mxu0  ;;  %v117_v22 = vpop.f32.mrf.mxu1 }
  0x89   :  { %v106_v23 = vadd.f32 %v219_v20, %v105_v21  ;;  %v118_v24 = vadd.f32 %v219_v20, %v117_v22 }
  0x8b   :  { %154 = vst.msk [vmem:[#allocation2] sm:$0xff] %vm153_vm1, %v106_v23 }
  0x8c   :  { %158 = vst.msk [vmem:[#allocation2 + $0x20] sm:$0xff] %vm153_vm1, %v118_v24  ;;  %v129_v25 = vpop.f32.mrf.mxu2  ;;  %v141_v26 = vpop.f32.mrf.mxu3 }
  0x8d   :  { %v130_v27 = vadd.f32 %v219_v20, %v129_v25  ;;  %v142_v28 = vadd.f32 %v219_v20, %v141_v26 }
  0x8f   :  { %162 = vst.msk [vmem:[#allocation2 + $0x40] sm:$0xff] %vm153_vm1, %v130_v27 }
  0x90   :  { %166 = vst.msk [vmem:[#allocation2 + $0x60] sm:$0xff] %vm153_vm1, %v142_v28  ;;  %v108_v29 = vpop.f32.mrf.mxu0  ;;  %v120_v30 = vpop.f32.mrf.mxu1 }
  0x91   :  { %v109_v31 = vadd.f32 %v219_v20, %v108_v29  ;;  %v121_v32 = vadd.f32 %v219_v20, %v120_v30 }
  0x93   :  { %155 = vst.msk [vmem:[#allocation2 + $0x8] sm:$0xff] %vm153_vm1, %v109_v31 }
  0x94   :  { %159 = vst.msk [vmem:[#allocation2 + $0x28] sm:$0xff] %vm153_vm1, %v121_v32  ;;  %v132_v33 = vpop.f32.mrf.mxu2  ;;  %v144_v34 = vpop.f32.mrf.mxu3 }
  0x95   :  { %v133_v35 = vadd.f32 %v219_v20, %v132_v33  ;;  %v145_v36 = vadd.f32 %v219_v20, %v144_v34 }
  0x97   :  { %163 = vst.msk [vmem:[#allocation2 + $0x48] sm:$0xff] %vm153_vm1, %v133_v35 }
  0x98   :  { %167 = vst.msk [vmem:[#allocation2 + $0x68] sm:$0xff] %vm153_vm1, %v145_v36  ;;  %v111_v37 = vpop.f32.mrf.mxu0  ;;  %v123_v38 = vpop.f32.mrf.mxu1 }
  0x99   :  { %v112_v39 = vadd.f32 %v219_v20, %v111_v37  ;;  %v124_v40 = vadd.f32 %v219_v20, %v123_v38 }
  0x9b   :  { %156 = vst.msk [vmem:[#allocation2 + $0x10] sm:$0xff] %vm153_vm1, %v112_v39 }
  0x9c   :  { %160 = vst.msk [vmem:[#allocation2 + $0x30] sm:$0xff] %vm153_vm1, %v124_v40  ;;  %v135_v41 = vpop.f32.mrf.mxu2  ;;  %v147_v42 = vpop.f32.mrf.mxu3 }
  0x9d   :  { %v136_v43 = vadd.f32 %v219_v20, %v135_v41  ;;  %v148_v44 = vadd.f32 %v219_v20, %v147_v42 }
  0x9f   :  { %164 = vst.msk [vmem:[#allocation2 + $0x50] sm:$0xff] %vm153_vm1, %v136_v43 }
  0xa0   :  { %168 = vst.msk [vmem:[#allocation2 + $0x70] sm:$0xff] %vm153_vm1, %v148_v44  ;;  %v114_v45 = vpop.f32.mrf.mxu0  ;;  %v126_v46 = vpop.f32.mrf.mxu1 }
  0xa1   :  { %v115_v47 = vadd.f32 %v219_v20, %v114_v45  ;;  %v127_v48 = vadd.f32 %v219_v20, %v126_v46 }
  0xa3   :  { %157 = vst.msk [vmem:[#allocation2 + $0x18] sm:$0xff] %vm153_vm1, %v115_v47 }
  0xa4   :  { %161 = vst.msk [vmem:[#allocation2 + $0x38] sm:$0xff] %vm153_vm1, %v127_v48  ;;  %v138_v49 = vpop.f32.mrf.mxu2  ;;  %v150_v50 = vpop.f32.mrf.mxu3 }
  0xa5   :  { %v139_v51 = vadd.f32 %v219_v20, %v138_v49  ;;  %v151_v52 = vadd.f32 %v219_v20, %v150_v50 }
  0xa7   :  { %165 = vst.msk [vmem:[#allocation2 + $0x58] sm:$0xff] %vm153_vm1, %v139_v51 }
  0xa8   :  { %169 = vst.msk [vmem:[#allocation2 + $0x78] sm:$0xff] %vm153_vm1, %v151_v52 }
  0xa9   :  { %173 = vsyncadd [#allocation3], 2016  ;;  %s176_s1 = sshll.u32 %s370_s3, 4  ;;  %s246_s26 = smov [#allocation2]   ;;  %s177_s1 = int_to_ptr.hbm [resolvable:$true] %s176_s1 }
  0xaa   :  { %s174_s27 = sshll.u32 %s246_s26, 4  ;;  %s247_s28 = smov 32   ;;  %s175_s27 = int_to_ptr.vmem [resolvable:$true] %s174_s27 }
  0xab   :  { %s248_s29 = smov 2  }
  0xac   :  { %182 = dma.vmem_to_hbm [thread:$0]  %s175_s27, 32, %s177_s1, [#allocation3], %s247_s28, %s247_s28, %s248_s29  }
  0xad   :  { %244 = dma.done.wait [#allocation3], 2048  }
  0xae   :  { %245 = vsyncadd [#allocation3], 4294965248 }
  0xaf   :  { %187 = vsyncpa [#allocation3], 1 }

</bundles_post_ra>
